<compile_context>
chip_gen: v6e
topology: v6e:2x2x1
jax: 0.10.0
libtpu: 0.0.40
codegen_flags: <defaults>
</compile_context>

<pallas_src>
import math
from functools import partial

import jax
import jax.numpy as jnp
from jax.experimental import pallas as pl
from jax.experimental.pallas import tpu as pltpu


# ----------------------------------------------------------------------------
# Fused Pallas kernel: embedding lookup + num_layers GRU cells (seq_len == 1).
# ----------------------------------------------------------------------------
def _make_encoder_kernel(num_layers: int, hidden_size: int, batch_size: int):
    H = hidden_size
    B = batch_size

    def kernel(ids_ref, emb_ref, h_ref, *rest):
        # rest = (wx_0, wh_0, bx_0, bhn_0, ..., hnew_ref, x_scratch)
        nwb = 4 * num_layers
        wb = rest[:nwb]
        hnew_ref = rest[nwb]
        x_scratch = rest[nwb + 1]

        # ---- Embedding gather: B scalar-indexed row reads, no one-hot MXU pass ----
        # ids live in SMEM; emb table is (V, 1, E) so the dynamic index is on the
        # untiled leading axis (well-supported dynamic addressing path).
        for i in range(B):
            x_scratch[pl.ds(i, 1), :] = emb_ref[ids_ref[i]]          # (1, E)
        x = x_scratch[...]                                            # (B, E)

        # Layers are inherently sequential -> static unroll inside the single kernel.
        for l in range(num_layers):
            wx = wb[4 * l][...]                                       # (in_dim, 3H)
            wh = wb[4 * l + 1][...]                                   # (H, 3H)
            bx = wb[4 * l + 2][...]                                   # (1, 3H)
            bhn = wb[4 * l + 3][...]                                  # (1, H)
            h_prev = h_ref[l]                                         # (B, H)

            # Two dense MXU pushes (independent -> pipelined), no zero-padded cols.
            gx = jnp.dot(x, wx, preferred_element_type=jnp.float32) + bx      # (B, 3H)
            gh = jnp.dot(h_prev, wh, preferred_element_type=jnp.float32)      # (B, 3H)

            # One EUP dispatch for both r and z (2H-wide operand).
            rz = jax.nn.sigmoid(gx[:, :2 * H] + gh[:, :2 * H])        # (B, 2H)
            r = rz[:, :H]
            z = rz[:, H:]
            # torch.nn.GRU: n = tanh(i_n + b_in + r * (h_n + b_hn))
            n = jnp.tanh(gx[:, 2 * H:] + r * (gh[:, 2 * H:] + bhn))
            h_new = (1.0 - z) * n + z * h_prev

            hnew_ref[l] = h_new.astype(hnew_ref.dtype)
            x = h_new                                                 # feeds next layer

    return kernel


# ----------------------------------------------------------------------------
# Parameter init (deterministic, shapes follow nn.Embedding / nn.GRU).
# ----------------------------------------------------------------------------
def init_params(key, vocab_size, embedding_size, hidden_size, num_layers):
    keys = jax.random.split(key, 1 + 4 * num_layers)
    params = {
        "embedding": jax.random.normal(keys[0], (vocab_size, embedding_size), jnp.float32)
    }
    bound = 1.0 / math.sqrt(hidden_size)
    for l in range(num_layers):
        in_dim = embedding_size if l == 0 else hidden_size
        kw_ih, kw_hh, kb_ih, kb_hh = keys[1 + 4 * l: 5 + 4 * l]
        params[f"w_ih_{l}"] = jax.random.uniform(
            kw_ih, (3 * hidden_size, in_dim), jnp.float32, -bound, bound)
        params[f"w_hh_{l}"] = jax.random.uniform(
            kw_hh, (3 * hidden_size, hidden_size), jnp.float32, -bound, bound)
        params[f"b_ih_{l}"] = jax.random.uniform(
            kb_ih, (3 * hidden_size,), jnp.float32, -bound, bound)
        params[f"b_hh_{l}"] = jax.random.uniform(
            kb_hh, (3 * hidden_size,), jnp.float32, -bound, bound)
    return params


def prepare_params(params, *, num_layers, embedding_size, hidden_size):
    """One-time prep (no zero padding, no per-step transposes in XLA).

    Per layer:
      w_x  (in_dim, 3H) = W_ih^T           gate cols [r | z | n]
      w_h  (H, 3H)      = W_hh^T           gate cols [r | z | n]
      b_x  (1, 3H)      = [b_ir+b_hr | b_iz+b_hz | b_in]
      b_hn (1, H)       = b_hn             (kept separate so n = tanh(i_n+b_in + r*(h_n+b_hn)))
    Embedding table reshaped to (V, 1, E) so the kernel can dynamic-index rows
    on the untiled leading axis.
    """
    H = hidden_size
    V, E = params["embedding"].shape
    prepped = {"embedding": params["embedding"].reshape(V, 1, E)}
    for l in range(num_layers):
        w_ih = params[f"w_ih_{l}"]                      # (3H, in_dim)
        w_hh = params[f"w_hh_{l}"]                      # (3H, H)
        b_ih = params[f"b_ih_{l}"]
        b_hh = params[f"b_hh_{l}"]
        prepped[f"w_x_{l}"] = w_ih.T                    # (in_dim, 3H)
        prepped[f"w_h_{l}"] = w_hh.T                    # (H, 3H)
        prepped[f"b_x_{l}"] = jnp.concatenate(
            [b_ih[:2 * H] + b_hh[:2 * H], b_ih[2 * H:]]).reshape(1, 3 * H)
        prepped[f"b_hn_{l}"] = b_hh[2 * H:].reshape(1, H)
    return prepped


# ----------------------------------------------------------------------------
# Forward pass: one fused pallas_call (embedding + all GRU layers), jitted with
# the hidden buffer donated so the pallas alias updates it in place.
# ----------------------------------------------------------------------------
@partial(jax.jit, static_argnames=("num_layers", "hidden_size"),
         donate_argnames=("hidden",))
def encoder_rnn_forward(prepped, input_ids, hidden, *, num_layers, hidden_size):
    B = input_ids.shape[0]
    L, _, H = hidden.shape
    emb3d = prepped["embedding"]                         # (V, 1, E)
    E = emb3d.shape[-1]

    ids = input_ids.astype(jnp.int32)

    vmem = pl.BlockSpec(memory_space=pltpu.MemorySpace.VMEM)
    smem = pl.BlockSpec(memory_space=pltpu.MemorySpace.SMEM)

    args = [ids, emb3d, hidden]
    in_specs = [smem, vmem, vmem]
    for l in range(num_layers):
        args += [prepped[f"w_x_{l}"], prepped[f"w_h_{l}"],
                 prepped[f"b_x_{l}"], prepped[f"b_hn_{l}"]]
        in_specs += [vmem, vmem, vmem, vmem]

    new_hidden = pl.pallas_call(
        _make_encoder_kernel(num_layers, hidden_size, B),
        out_shape=jax.ShapeDtypeStruct((L, B, H), jnp.float32),
        in_specs=in_specs,
        out_specs=vmem,
        scratch_shapes=[pltpu.VMEM((B, E), jnp.float32)],
        # Hidden-state buffer (input index 2) is updated in place as the output.
        input_output_aliases={2: 0},
    )(*args)

    # seq_len == 1: the GRU "output" is exactly the last layer's new hidden.
    output = new_hidden[L - 1:L]                         # (1, B, H)
    return output, new_hidden


# Pure-JAX reference of the same math (built from the ORIGINAL torch-layout params,
# so it independently checks the prepared-weight construction).
def _ref_forward(params, input_ids, hidden, *, num_layers):
    x = jnp.take(params["embedding"], input_ids, axis=0)
    new_hidden = []
    for l in range(num_layers):
        h = hidden[l]
        gi = x @ params[f"w_ih_{l}"].T + params[f"b_ih_{l}"]
        gh = h @ params[f"w_hh_{l}"].T + params[f"b_hh_{l}"]
        H = h.shape[1]
        r = jax.nn.sigmoid(gi[:, :H] + gh[:, :H])
        z = jax.nn.sigmoid(gi[:, H:2 * H] + gh[:, H:2 * H])
        n = jnp.tanh(gi[:, 2 * H:] + r * gh[:, 2 * H:])
        h_new = (1.0 - z) * n + z * h
        new_hidden.append(h_new)
        x = h_new
    return x[None, :, :], jnp.stack(new_hidden, axis=0)


if __name__ == "__main__":
    VOCAB = 16          # input_size
    EMB = 32            # embedding_size
    HID = 32            # hidden_size
    LAYERS = 2          # num_hidden_layers
    BATCH = 8

    key = jax.random.PRNGKey(0)
    k_params, k_ids, k_h = jax.random.split(key, 3)
    params = init_params(k_params, VOCAB, EMB, HID, LAYERS)
    prepped = prepare_params(params, num_layers=LAYERS,
                             embedding_size=EMB, hidden_size=HID)

    input_ids = jax.random.randint(k_ids, (BATCH,), 0, VOCAB, dtype=jnp.int32)
    # Non-zero hidden so the W_hh / n-gate path is actually exercised.
    hidden0 = jax.random.normal(k_h, (LAYERS, BATCH, HID), jnp.float32)

    # Compute the reference first: hidden0's buffer is donated to the kernel
    # (jit donation + input_output_aliases) and must not be read afterwards.
    ref_out, ref_hid = _ref_forward(params, input_ids, hidden0, num_layers=LAYERS)
    ref_out = jax.block_until_ready(ref_out)
    ref_hid = jax.block_until_ready(ref_hid)

    output, hidden1 = encoder_rnn_forward(prepped, input_ids, hidden0,
                                          num_layers=LAYERS, hidden_size=HID)
    output = jax.block_until_ready(output)
    hidden1 = jax.block_until_ready(hidden1)

    assert output.shape == (1, BATCH, HID)
    assert hidden1.shape == (LAYERS, BATCH, HID)
    assert jnp.allclose(output, ref_out, atol=1e-5, rtol=1e-5)
    assert jnp.allclose(hidden1, ref_hid, atol=1e-5, rtol=1e-5)

    print("KERNEL_OK")
</pallas_src>

<mosaic_0001>
module attributes {stable_mosaic.version = 11 : i64} {
  func.func @kernel(%arg0: memref<8xi32, #tpu.memory_space<smem>>, %arg1: memref<16x1x32xf32, #tpu.memory_space<vmem>>, %arg2: memref<2x8x32xf32, #tpu.memory_space<vmem>>, %arg3: memref<32x96xf32, #tpu.memory_space<vmem>>, %arg4: memref<32x96xf32, #tpu.memory_space<vmem>>, %arg5: memref<1x96xf32, #tpu.memory_space<vmem>>, %arg6: memref<1x32xf32, #tpu.memory_space<vmem>>, %arg7: memref<32x96xf32, #tpu.memory_space<vmem>>, %arg8: memref<32x96xf32, #tpu.memory_space<vmem>>, %arg9: memref<1x96xf32, #tpu.memory_space<vmem>>, %arg10: memref<1x32xf32, #tpu.memory_space<vmem>>, %arg11: memref<2x8x32xf32, #tpu.memory_space<vmem>>, %arg12: memref<8x32xf32, #tpu.memory_space<vmem>>) attributes {dimension_semantics = [], scalar_prefetch = 0 : i64, scratch_operands = 1 : i64, tpu.core_type = #tpu.core_type<tc>} {
    %c0 = arith.constant 0 : index
    %0 = memref.load %arg0[%c0] : memref<8xi32, #tpu.memory_space<smem>>
    %1 = arith.index_cast %0 : i32 to index
    %c0_0 = arith.constant 0 : index
    %c0_1 = arith.constant 0 : index
    %2 = vector.load %arg1[%1, %c0_0, %c0_1] : memref<16x1x32xf32, #tpu.memory_space<vmem>>, vector<1x1x32xf32>
    %3 = vector.shape_cast %2 : vector<1x1x32xf32> to vector<1x32xf32>
    %c0_2 = arith.constant 0 : index
    %c0_3 = arith.constant 0 : index
    %4 = vector.load %arg12[%c0_2, %c0_3] : memref<8x32xf32, #tpu.memory_space<vmem>>, vector<1x32xf32>
    tpu.vector_store %arg12[%c0_2, %c0_3], %3 {strides = array<i32>} : memref<8x32xf32, #tpu.memory_space<vmem>>, vector<1x32xf32>,
    %c1 = arith.constant 1 : index
    %5 = memref.load %arg0[%c1] : memref<8xi32, #tpu.memory_space<smem>>
    %6 = arith.index_cast %5 : i32 to index
    %c0_4 = arith.constant 0 : index
    %c0_5 = arith.constant 0 : index
    %7 = vector.load %arg1[%6, %c0_4, %c0_5] : memref<16x1x32xf32, #tpu.memory_space<vmem>>, vector<1x1x32xf32>
    %8 = vector.shape_cast %7 : vector<1x1x32xf32> to vector<1x32xf32>
    %c1_6 = arith.constant 1 : index
    %c0_7 = arith.constant 0 : index
    %9 = vector.load %arg12[%c1_6, %c0_7] : memref<8x32xf32, #tpu.memory_space<vmem>>, vector<1x32xf32>
    tpu.vector_store %arg12[%c1_6, %c0_7], %8 {strides = array<i32>} : memref<8x32xf32, #tpu.memory_space<vmem>>, vector<1x32xf32>,
    %c2 = arith.constant 2 : index
    %10 = memref.load %arg0[%c2] : memref<8xi32, #tpu.memory_space<smem>>
    %11 = arith.index_cast %10 : i32 to index
    %c0_8 = arith.constant 0 : index
    %c0_9 = arith.constant 0 : index
    %12 = vector.load %arg1[%11, %c0_8, %c0_9] : memref<16x1x32xf32, #tpu.memory_space<vmem>>, vector<1x1x32xf32>
    %13 = vector.shape_cast %12 : vector<1x1x32xf32> to vector<1x32xf32>
    %c2_10 = arith.constant 2 : index
    %c0_11 = arith.constant 0 : index
    %14 = vector.load %arg12[%c2_10, %c0_11] : memref<8x32xf32, #tpu.memory_space<vmem>>, vector<1x32xf32>
    tpu.vector_store %arg12[%c2_10, %c0_11], %13 {strides = array<i32>} : memref<8x32xf32, #tpu.memory_space<vmem>>, vector<1x32xf32>,
    %c3 = arith.constant 3 : index
    %15 = memref.load %arg0[%c3] : memref<8xi32, #tpu.memory_space<smem>>
    %16 = arith.index_cast %15 : i32 to index
    %c0_12 = arith.constant 0 : index
    %c0_13 = arith.constant 0 : index
    %17 = vector.load %arg1[%16, %c0_12, %c0_13] : memref<16x1x32xf32, #tpu.memory_space<vmem>>, vector<1x1x32xf32>
    %18 = vector.shape_cast %17 : vector<1x1x32xf32> to vector<1x32xf32>
    %c3_14 = arith.constant 3 : index
    %c0_15 = arith.constant 0 : index
    %19 = vector.load %arg12[%c3_14, %c0_15] : memref<8x32xf32, #tpu.memory_space<vmem>>, vector<1x32xf32>
    tpu.vector_store %arg12[%c3_14, %c0_15], %18 {strides = array<i32>} : memref<8x32xf32, #tpu.memory_space<vmem>>, vector<1x32xf32>,
    %c4 = arith.constant 4 : index
    %20 = memref.load %arg0[%c4] : memref<8xi32, #tpu.memory_space<smem>>
    %21 = arith.index_cast %20 : i32 to index
    %c0_16 = arith.constant 0 : index
    %c0_17 = arith.constant 0 : index
    %22 = vector.load %arg1[%21, %c0_16, %c0_17] : memref<16x1x32xf32, #tpu.memory_space<vmem>>, vector<1x1x32xf32>
    %23 = vector.shape_cast %22 : vector<1x1x32xf32> to vector<1x32xf32>
    %c4_18 = arith.constant 4 : index
    %c0_19 = arith.constant 0 : index
    %24 = vector.load %arg12[%c4_18, %c0_19] : memref<8x32xf32, #tpu.memory_space<vmem>>, vector<1x32xf32>
    tpu.vector_store %arg12[%c4_18, %c0_19], %23 {strides = array<i32>} : memref<8x32xf32, #tpu.memory_space<vmem>>, vector<1x32xf32>,
    %c5 = arith.constant 5 : index
    %25 = memref.load %arg0[%c5] : memref<8xi32, #tpu.memory_space<smem>>
    %26 = arith.index_cast %25 : i32 to index
    %c0_20 = arith.constant 0 : index
    %c0_21 = arith.constant 0 : index
    %27 = vector.load %arg1[%26, %c0_20, %c0_21] : memref<16x1x32xf32, #tpu.memory_space<vmem>>, vector<1x1x32xf32>
    %28 = vector.shape_cast %27 : vector<1x1x32xf32> to vector<1x32xf32>
    %c5_22 = arith.constant 5 : index
    %c0_23 = arith.constant 0 : index
    %29 = vector.load %arg12[%c5_22, %c0_23] : memref<8x32xf32, #tpu.memory_space<vmem>>, vector<1x32xf32>
    tpu.vector_store %arg12[%c5_22, %c0_23], %28 {strides = array<i32>} : memref<8x32xf32, #tpu.memory_space<vmem>>, vector<1x32xf32>,
    %c6 = arith.constant 6 : index
    %30 = memref.load %arg0[%c6] : memref<8xi32, #tpu.memory_space<smem>>
    %31 = arith.index_cast %30 : i32 to index
    %c0_24 = arith.constant 0 : index
    %c0_25 = arith.constant 0 : index
    %32 = vector.load %arg1[%31, %c0_24, %c0_25] : memref<16x1x32xf32, #tpu.memory_space<vmem>>, vector<1x1x32xf32>
    %33 = vector.shape_cast %32 : vector<1x1x32xf32> to vector<1x32xf32>
    %c6_26 = arith.constant 6 : index
    %c0_27 = arith.constant 0 : index
    %34 = vector.load %arg12[%c6_26, %c0_27] : memref<8x32xf32, #tpu.memory_space<vmem>>, vector<1x32xf32>
    tpu.vector_store %arg12[%c6_26, %c0_27], %33 {strides = array<i32>} : memref<8x32xf32, #tpu.memory_space<vmem>>, vector<1x32xf32>,
    %c7 = arith.constant 7 : index
    %35 = memref.load %arg0[%c7] : memref<8xi32, #tpu.memory_space<smem>>
    %36 = arith.index_cast %35 : i32 to index
    %c0_28 = arith.constant 0 : index
    %c0_29 = arith.constant 0 : index
    %37 = vector.load %arg1[%36, %c0_28, %c0_29] : memref<16x1x32xf32, #tpu.memory_space<vmem>>, vector<1x1x32xf32>
    %38 = vector.shape_cast %37 : vector<1x1x32xf32> to vector<1x32xf32>
    %c7_30 = arith.constant 7 : index
    %c0_31 = arith.constant 0 : index
    %39 = vector.load %arg12[%c7_30, %c0_31] : memref<8x32xf32, #tpu.memory_space<vmem>>, vector<1x32xf32>
    tpu.vector_store %arg12[%c7_30, %c0_31], %38 {strides = array<i32>} : memref<8x32xf32, #tpu.memory_space<vmem>>, vector<1x32xf32>,
    %c0_32 = arith.constant 0 : index
    %c0_33 = arith.constant 0 : index
    %40 = vector.load %arg12[%c0_32, %c0_33] : memref<8x32xf32, #tpu.memory_space<vmem>>, vector<8x32xf32>
    %c0_34 = arith.constant 0 : index
    %c0_35 = arith.constant 0 : index
    %41 = vector.load %arg3[%c0_34, %c0_35] : memref<32x96xf32, #tpu.memory_space<vmem>>, vector<32x96xf32>
    %c0_36 = arith.constant 0 : index
    %c0_37 = arith.constant 0 : index
    %42 = vector.load %arg4[%c0_36, %c0_37] : memref<32x96xf32, #tpu.memory_space<vmem>>, vector<32x96xf32>
    %c0_38 = arith.constant 0 : index
    %c0_39 = arith.constant 0 : index
    %43 = vector.load %arg5[%c0_38, %c0_39] : memref<1x96xf32, #tpu.memory_space<vmem>>, vector<1x96xf32>
    %c0_40 = arith.constant 0 : index
    %c0_41 = arith.constant 0 : index
    %44 = vector.load %arg6[%c0_40, %c0_41] : memref<1x32xf32, #tpu.memory_space<vmem>>, vector<1x32xf32>
    %c0_42 = arith.constant 0 : index
    %c0_43 = arith.constant 0 : index
    %c0_44 = arith.constant 0 : index
    %45 = vector.load %arg2[%c0_42, %c0_43, %c0_44] : memref<2x8x32xf32, #tpu.memory_space<vmem>>, vector<1x8x32xf32>
    %46 = vector.shape_cast %45 : vector<1x8x32xf32> to vector<8x32xf32>
    %cst = arith.constant dense<0.000000e+00> : vector<8x96xf32>
    %47 = tpu.matmul %40, %41, %cst {dimension_numbers = #tpu.dot_dimension_numbers<[1], [0], [0], [1], [0, 0, 1, 1], [], []>} : vector<8x32xf32>, vector<32x96xf32>, vector<8x96xf32> -> vector<8x96xf32>
    %48 = vector.broadcast %43 : vector<1x96xf32> to vector<8x96xf32>
    %49 = arith.addf %47, %48 : vector<8x96xf32>
    %cst_45 = arith.constant dense<0.000000e+00> : vector<8x96xf32>
    %50 = tpu.matmul %46, %42, %cst_45 {dimension_numbers = #tpu.dot_dimension_numbers<[1], [0], [0], [1], [0, 0, 1, 1], [], []>} : vector<8x32xf32>, vector<32x96xf32>, vector<8x96xf32> -> vector<8x96xf32>
    %51 = vector.extract_strided_slice %49 {offsets = [0, 0], sizes = [8, 64], strides = [1, 1]} : vector<8x96xf32> to vector<8x64xf32>
    %52 = vector.extract_strided_slice %50 {offsets = [0, 0], sizes = [8, 64], strides = [1, 1]} : vector<8x96xf32> to vector<8x64xf32>
    %53 = arith.addf %51, %52 : vector<8x64xf32>
    %54 = arith.negf %53 : vector<8x64xf32>
    %55 = math.exp %54 : vector<8x64xf32>
    %cst_46 = arith.constant 1.000000e+00 : f32
    %56 = vector.broadcast %cst_46 : f32 to vector<8x64xf32>
    %57 = arith.addf %56, %55 : vector<8x64xf32>
    %58 = arith.divf %56, %57 : vector<8x64xf32>
    %59 = vector.extract_strided_slice %58 {offsets = [0, 0], sizes = [8, 32], strides = [1, 1]} : vector<8x64xf32> to vector<8x32xf32>
    %60 = vector.extract_strided_slice %58 {offsets = [0, 32], sizes = [8, 32], strides = [1, 1]} : vector<8x64xf32> to vector<8x32xf32>
    %61 = vector.extract_strided_slice %49 {offsets = [0, 64], sizes = [8, 32], strides = [1, 1]} : vector<8x96xf32> to vector<8x32xf32>
    %62 = vector.extract_strided_slice %50 {offsets = [0, 64], sizes = [8, 32], strides = [1, 1]} : vector<8x96xf32> to vector<8x32xf32>
    %63 = vector.broadcast %44 : vector<1x32xf32> to vector<8x32xf32>
    %64 = arith.addf %62, %63 : vector<8x32xf32>
    %65 = arith.mulf %59, %64 : vector<8x32xf32>
    %66 = arith.addf %61, %65 : vector<8x32xf32>
    %67 = math.tanh %66 : vector<8x32xf32>
    %cst_47 = arith.constant 1.000000e+00 : f32
    %68 = vector.broadcast %cst_47 : f32 to vector<8x32xf32>
    %69 = arith.subf %68, %60 : vector<8x32xf32>
    %70 = arith.mulf %69, %67 : vector<8x32xf32>
    %71 = arith.mulf %60, %46 : vector<8x32xf32>
    %72 = arith.addf %70, %71 : vector<8x32xf32>
    %c0_48 = arith.constant 0 : index
    %c0_49 = arith.constant 0 : index
    %c0_50 = arith.constant 0 : index
    %73 = vector.load %arg11[%c0_48, %c0_49, %c0_50] : memref<2x8x32xf32, #tpu.memory_space<vmem>>, vector<1x8x32xf32>
    %74 = vector.shape_cast %73 : vector<1x8x32xf32> to vector<8x32xf32>
    %75 = vector.shape_cast %72 : vector<8x32xf32> to vector<1x8x32xf32>
    tpu.vector_store %arg11[%c0_48, %c0_49, %c0_50], %75 {strides = array<i32>} : memref<2x8x32xf32, #tpu.memory_space<vmem>>, vector<1x8x32xf32>,
    %c0_51 = arith.constant 0 : index
    %c0_52 = arith.constant 0 : index
    %76 = vector.load %arg7[%c0_51, %c0_52] : memref<32x96xf32, #tpu.memory_space<vmem>>, vector<32x96xf32>
    %c0_53 = arith.constant 0 : index
    %c0_54 = arith.constant 0 : index
    %77 = vector.load %arg8[%c0_53, %c0_54] : memref<32x96xf32, #tpu.memory_space<vmem>>, vector<32x96xf32>
    %c0_55 = arith.constant 0 : index
    %c0_56 = arith.constant 0 : index
    %78 = vector.load %arg9[%c0_55, %c0_56] : memref<1x96xf32, #tpu.memory_space<vmem>>, vector<1x96xf32>
    %c0_57 = arith.constant 0 : index
    %c0_58 = arith.constant 0 : index
    %79 = vector.load %arg10[%c0_57, %c0_58] : memref<1x32xf32, #tpu.memory_space<vmem>>, vector<1x32xf32>
    %c1_59 = arith.constant 1 : index
    %c0_60 = arith.constant 0 : index
    %c0_61 = arith.constant 0 : index
    %80 = vector.load %arg2[%c1_59, %c0_60, %c0_61] : memref<2x8x32xf32, #tpu.memory_space<vmem>>, vector<1x8x32xf32>
    %81 = vector.shape_cast %80 : vector<1x8x32xf32> to vector<8x32xf32>
    %cst_62 = arith.constant dense<0.000000e+00> : vector<8x96xf32>
    %82 = tpu.matmul %72, %76, %cst_62 {dimension_numbers = #tpu.dot_dimension_numbers<[1], [0], [0], [1], [0, 0, 1, 1], [], []>} : vector<8x32xf32>, vector<32x96xf32>, vector<8x96xf32> -> vector<8x96xf32>
    %83 = vector.broadcast %78 : vector<1x96xf32> to vector<8x96xf32>
    %84 = arith.addf %82, %83 : vector<8x96xf32>
    %cst_63 = arith.constant dense<0.000000e+00> : vector<8x96xf32>
    %85 = tpu.matmul %81, %77, %cst_63 {dimension_numbers = #tpu.dot_dimension_numbers<[1], [0], [0], [1], [0, 0, 1, 1], [], []>} : vector<8x32xf32>, vector<32x96xf32>, vector<8x96xf32> -> vector<8x96xf32>
    %86 = vector.extract_strided_slice %84 {offsets = [0, 0], sizes = [8, 64], strides = [1, 1]} : vector<8x96xf32> to vector<8x64xf32>
    %87 = vector.extract_strided_slice %85 {offsets = [0, 0], sizes = [8, 64], strides = [1, 1]} : vector<8x96xf32> to vector<8x64xf32>
    %88 = arith.addf %86, %87 : vector<8x64xf32>
    %89 = arith.negf %88 : vector<8x64xf32>
    %90 = math.exp %89 : vector<8x64xf32>
    %cst_64 = arith.constant 1.000000e+00 : f32
    %91 = vector.broadcast %cst_64 : f32 to vector<8x64xf32>
    %92 = arith.addf %91, %90 : vector<8x64xf32>
    %93 = arith.divf %91, %92 : vector<8x64xf32>
    %94 = vector.extract_strided_slice %93 {offsets = [0, 0], sizes = [8, 32], strides = [1, 1]} : vector<8x64xf32> to vector<8x32xf32>
    %95 = vector.extract_strided_slice %93 {offsets = [0, 32], sizes = [8, 32], strides = [1, 1]} : vector<8x64xf32> to vector<8x32xf32>
    %96 = vector.extract_strided_slice %84 {offsets = [0, 64], sizes = [8, 32], strides = [1, 1]} : vector<8x96xf32> to vector<8x32xf32>
    %97 = vector.extract_strided_slice %85 {offsets = [0, 64], sizes = [8, 32], strides = [1, 1]} : vector<8x96xf32> to vector<8x32xf32>
    %98 = vector.broadcast %79 : vector<1x32xf32> to vector<8x32xf32>
    %99 = arith.addf %97, %98 : vector<8x32xf32>
    %100 = arith.mulf %94, %99 : vector<8x32xf32>
    %101 = arith.addf %96, %100 : vector<8x32xf32>
    %102 = math.tanh %101 : vector<8x32xf32>
    %cst_65 = arith.constant 1.000000e+00 : f32
    %103 = vector.broadcast %cst_65 : f32 to vector<8x32xf32>
    %104 = arith.subf %103, %95 : vector<8x32xf32>
    %105 = arith.mulf %104, %102 : vector<8x32xf32>
    %106 = arith.mulf %95, %81 : vector<8x32xf32>
    %107 = arith.addf %105, %106 : vector<8x32xf32>
    %c1_66 = arith.constant 1 : index
    %c0_67 = arith.constant 0 : index
    %c0_68 = arith.constant 0 : index
    %108 = vector.load %arg11[%c1_66, %c0_67, %c0_68] : memref<2x8x32xf32, #tpu.memory_space<vmem>>, vector<1x8x32xf32>
    %109 = vector.shape_cast %108 : vector<1x8x32xf32> to vector<8x32xf32>
    %110 = vector.shape_cast %107 : vector<8x32xf32> to vector<1x8x32xf32>
    tpu.vector_store %arg11[%c1_66, %c0_67, %c0_68], %110 {strides = array<i32>} : memref<2x8x32xf32, #tpu.memory_space<vmem>>, vector<1x8x32xf32>,
    return
  }
}

</mosaic_0001>

<bundles_post_ra>
// kernel: encoder_rnn_forward.1
= control target key start
LH: loop header
LB: loop body
LE: loop exit
PB: predicated region body
PF: predicated region fallthrough
CT: control target
= control target key end

     0   :  { %16 = vsyncpa [#allocation5], 0  ;;  %s1123_s0 = inlined_call_operand.vmem [shape: s32[8], index: 0, kind: input, shape index: {}]   ;;  %s1124_s1 = inlined_call_operand.hbm [shape: f32[16,1,32], index: 1, kind: input, shape index: {}]   ;;  %s1125_s2 = inlined_call_operand.vmem [shape: f32[2,8,32], index: 2, kind: input, shape index: {}, may-alias: {2,11}]   ;;  %s1126_s3 = inlined_call_operand.hbm [shape: f32[32,96], index: 3, kind: input, shape index: {}]   ;;  %s1127_s4 = inlined_call_operand.hbm [shape: f32[32,96], index: 4, kind: input, shape index: {}]   ;;  %s1128_s5 = inlined_call_operand.vmem [shape: f32[1,96], index: 5, kind: input, shape index: {}]   ;;  %s1129_s6 = inlined_call_operand.hbm [shape: f32[1,32], index: 6, kind: input, shape index: {}]   ;;  %s1130_s7 = inlined_call_operand.hbm [shape: f32[32,96], index: 7, kind: input, shape index: {}]   ;;  %s1131_s8 = inlined_call_operand.hbm [shape: f32[32,96], index: 8, kind: input, shape index: {}]   ;;  %s1132_s9 = inlined_call_operand.hbm [shape: f32[1,96], index: 9, kind: input, shape index: {}]   ;;  %s1133_s10 = inlined_call_operand.hbm [shape: f32[1,32], index: 10, kind: input, shape index: {}]   ;;  %s1134_s11 = inlined_call_operand.vmem [shape: f32[2,8,32], index: 11, kind: output, shape index: {}, may-alias: {2,11}]  }
   0x1   :  { %17 = vsyncpa [#allocation4], 0 }
   0x2   :  { %18 = vsyncpa [#allocation8], 0 }
   0x3   :  { %19 = vsyncpa [#allocation11], 0 }
   0x4   :  { %20 = vsyncpa [#allocation14], 0 }
   0x5   :  { %21 = vsyncpa [#allocation17], 0  ;;  %s917_s17 = smov [#allocation7]  }
   0x6   :  { %s51_s18 = sshll.u32 %s917_s17, 4  ;;  %s52_s18 = int_to_ptr.vmem [resolvable:$true] %s51_s18 }
   0x7   :  { %s741_s19 = scalar_lea.vmem %s52_s18, 512  ;;  %p746_p1 = scmp.lt.s32.totalorder %s52_s18, %s52_s18 }
   0x8   :  { %p742_p0 = scmp.ne.s32.totalorder %s52_s18, %s741_s19  ;;  %p747_p2 = scmp.lt.s32.totalorder %s741_s19, %s741_s19 }
   0xa   :  { %p748_p3 = por %p747_p2, %p746_p1 }
   0xc   :  { %p749_p4 = pnand %p748_p3, %p742_p0 }
   0xe   :  { %752 = shalt.err (!%p749_p4)
}
   0xf   :  { %s918_s20 = smov 128   ;;  %s919_s21 = smov 8  }
  0x10   :  { %57 = dma.hbm_to_vmem [thread:$0]  %s1126_s3, 512, %s52_s18, [#allocation8], %s918_s20, %s918_s20, %s919_s21  }
  0x11   :  { %s920_s24 = smov [#allocation10]   ;;  %s921_s26 = smov [#allocation13]  }
  0x12   :  { %s78_s25 = sshll.u32 %s920_s24, 4  ;;  %s99_s27 = sshll.u32 %s921_s26, 4  ;;  %s79_s25 = int_to_ptr.vmem [resolvable:$true] %s78_s25  ;;  %s100_s27 = int_to_ptr.vmem [resolvable:$true] %s99_s27 }
  0x13   :  { %s761_s28 = scalar_lea.vmem %s79_s25, 16  ;;  %s765_s29 = scalar_lea.vmem %s79_s25, 32 }
  0x14   :  { %p762_p5 = scmp.ne.s32.totalorder %s79_s25, %s761_s28  ;;  %p766_p6 = scmp.lt.s32.totalorder %s79_s25, %s79_s25 }
  0x15   :  { %p767_p7 = scmp.lt.s32.totalorder %s765_s29, %s761_s28 }
  0x17   :  { %p768_p8 = por %p767_p7, %p766_p6 }
  0x19   :  { %p769_p9 = pnand %p768_p8, %p762_p5 }
  0x1b   :  { %772 = shalt.err (!%p769_p9)
}
  0x1c   :  { %81 = dma.hbm_to_vmem [thread:$0]  %s1129_s6, 16, %s79_s25, [#allocation11]  }
  0x1d   :  { %s28_s14 = sshll.u32 %s1123_s0, 4  ;;  %s781_s15 = scalar_lea.vmem %s100_s27, 512  ;;  %s29_s14 = int_to_ptr.vmem [resolvable:$true] %s28_s14 }
  0x1e   :  { %p782_p10 = scmp.ne.s32.totalorder %s100_s27, %s781_s15  ;;  %p786_p11 = scmp.lt.s32.totalorder %s100_s27, %s100_s27 }
  0x1f   :  { %p787_p12 = scmp.lt.s32.totalorder %s781_s15, %s781_s15 }
  0x21   :  { %p788_p13 = por %p787_p12, %p786_p11 }
  0x23   :  { %p789_p0 = pnand %p788_p13, %p782_p10 }
  0x25   :  { %792 = shalt.err (!%p789_p0)
}
  0x26   :  { %105 = dma.hbm_to_vmem [thread:$0]  %s1131_s8, 512, %s100_s27, [#allocation14], %s918_s20, %s918_s20, %s919_s21  }
  0x27   :  { %s793_s6 = scalar_lea.vmem %s29_s14, 16  ;;  %p798_p2 = scmp.lt.s32.totalorder %s29_s14, %s29_s14 }
  0x28   :  { %p794_p1 = scmp.ne.s32.totalorder %s29_s14, %s793_s6  ;;  %p799_p3 = scmp.lt.s32.totalorder %s793_s6, %s793_s6 }
  0x2a   :  { %p800_p4 = por %p799_p3, %p798_p2 }
  0x2c   :  { %p801_p5 = pnand %p800_p4, %p794_p1 }
  0x2e   :  { %804 = shalt.err (!%p801_p5)
}
  0x2f   :  { %s922_s0 = smov [#allocation3]   ;;  %s923_s18 = smov [#allocation6]  }
  0x30   :  { %31 = dma.vmem_to_smem %s29_s14, 16, %s922_s0, [#allocation5]  }
  0x31   :  { %s37_s19 = sshll.u32 %s923_s18, 4  ;;  %s38_s19 = int_to_ptr.vmem [resolvable:$true] %s37_s19 }
  0x32   :  { %s813_s22 = scalar_lea.vmem %s38_s19, 256  ;;  %p818_p7 = scmp.lt.s32.totalorder %s38_s19, %s38_s19 }
  0x33   :  { %p814_p6 = scmp.ne.s32.totalorder %s38_s19, %s813_s22  ;;  %p819_p8 = scmp.lt.s32.totalorder %s813_s22, %s813_s22 }
  0x35   :  { %p820_p9 = por %p819_p8, %p818_p7 }
  0x37   :  { %p821_p10 = pnand %p820_p9, %p814_p6 }
  0x39   :  { %824 = shalt.err (!%p821_p10)
}
  0x3a   :  { %s924_s8 = smov 16   ;;  %s925_s23 = smov 1  }
  0x3b   :  { %43 = dma.hbm_to_vmem [thread:$0]  %s1124_s1, 256, %s38_s19, [#allocation4], %s924_s8, %s924_s8, %s925_s23  }
  0x3c   :  { %s926_s26 = smov [#allocation9]   ;;  %s927_s28 = smov [#allocation12]  }
  0x3d   :  { %s63_s27 = sshll.u32 %s926_s26, 4  ;;  %s87_s29 = sshll.u32 %s927_s28, 4  ;;  %s64_s27 = int_to_ptr.vmem [resolvable:$true] %s63_s27  ;;  %s88_s29 = int_to_ptr.vmem [resolvable:$true] %s87_s29 }
  0x3e   :  { %s833_s30 = scalar_lea.vmem %s64_s27, 512  ;;  %p838_p12 = scmp.lt.s32.totalorder %s64_s27, %s64_s27 }
  0x3f   :  { %p834_p11 = scmp.ne.s32.totalorder %s64_s27, %s833_s30  ;;  %p839_p13 = scmp.lt.s32.totalorder %s833_s30, %s833_s30 }
  0x41   :  { %p840_p0 = por %p839_p13, %p838_p12 }
  0x43   :  { %p841_p1 = pnand %p840_p0, %p834_p11 }
  0x45   :  { %844 = shalt.err (!%p841_p1)
}
  0x46   :  { %69 = dma.hbm_to_vmem [thread:$0]  %s1127_s4, 512, %s64_s27, [#allocation8], %s918_s20, %s918_s20, %s919_s21  }
  0x47   :  { %s853_s1 = scalar_lea.vmem %s88_s29, 512  ;;  %p858_p3 = scmp.lt.s32.totalorder %s88_s29, %s88_s29 }
  0x48   :  { %p854_p2 = scmp.ne.s32.totalorder %s88_s29, %s853_s1  ;;  %p859_p4 = scmp.lt.s32.totalorder %s853_s1, %s853_s1 }
  0x4a   :  { %p860_p5 = por %p859_p4, %p858_p3 }
  0x4c   :  { %p861_p6 = pnand %p860_p5, %p854_p2 }
  0x4e   :  { %864 = shalt.err (!%p861_p6)
}
  0x4f   :  { %93 = dma.hbm_to_vmem [thread:$0]  %s1130_s7, 512, %s88_s29, [#allocation11], %s918_s20, %s918_s20, %s919_s21  }
  0x50   :  { %s928_s15 = smov [#allocation15]   ;;  %s929_s17 = smov [#allocation16]  }
  0x51   :  { %s112_s16 = sshll.u32 %s928_s15, 4  ;;  %s122_s4 = sshll.u32 %s929_s17, 4  ;;  %s113_s16 = int_to_ptr.vmem [resolvable:$true] %s112_s16  ;;  %s123_s4 = int_to_ptr.vmem [resolvable:$true] %s122_s4 }
  0x52   :  { %s873_s6 = scalar_lea.vmem %s113_s16, 16  ;;  %s877_s0 = scalar_lea.vmem %s113_s16, 32 }
  0x53   :  { %p874_p7 = scmp.ne.s32.totalorder %s113_s16, %s873_s6  ;;  %p878_p8 = scmp.lt.s32.totalorder %s113_s16, %s113_s16 }
  0x54   :  { %p879_p9 = scmp.lt.s32.totalorder %s877_s0, %s873_s6 }
  0x56   :  { %p880_p10 = por %p879_p9, %p878_p8 }
  0x58   :  { %p881_p11 = pnand %p880_p10, %p874_p7 }
  0x5a   :  { %884 = shalt.err (!%p881_p11)
}
  0x5b   :  { %115 = dma.hbm_to_vmem [thread:$0]  %s1132_s9, 16, %s113_s16, [#allocation14]  }
  0x5c   :  { %s893_s22 = scalar_lea.vmem %s123_s4, 16  ;;  %s897_s7 = scalar_lea.vmem %s123_s4, 32 }
  0x5d   :  { %p894_p12 = scmp.ne.s32.totalorder %s123_s4, %s893_s22  ;;  %p898_p13 = scmp.lt.s32.totalorder %s123_s4, %s123_s4 }
  0x5e   :  { %p899_p0 = scmp.lt.s32.totalorder %s897_s7, %s893_s22 }
  0x60   :  { %p900_p1 = por %p899_p0, %p898_p13 }
  0x62   :  { %p901_p2 = pnand %p900_p1, %p894_p12 }
  0x64   :  { %904 = shalt.err (!%p901_p2)
}
  0x65   :  { %125 = dma.hbm_to_vmem [thread:$0]  %s1133_s10, 16, %s123_s4, [#allocation17]  }
  0x66   :  { %905 = dma.done.wait [#allocation5], 16  }
  0x67   :  { %906 = vsyncadd [#allocation5], 4294967280 }
  0x68   :  { %907 = dma.done.wait [#allocation4], 256  }
  0x69   :  { %908 = vsyncadd [#allocation4], 4294967040 }
  0x6a   :  { %909 = dma.done.wait [#allocation8], 1024  }
  0x6b   :  { %910 = vsyncadd [#allocation8], 4294966272 }
  0x6c   :  { %911 = dma.done.wait [#allocation11], 528  }
  0x6d   :  { %912 = vsyncadd [#allocation11], 4294966768 }
  0x6e   :  { %913 = dma.done.wait [#allocation14], 528  }
  0x6f   :  { %914 = vsyncadd [#allocation14], 4294966768 }
  0x70   :  { %915 = dma.done.wait [#allocation17], 16  }
  0x71   :  { %916 = vsyncadd [#allocation17], 4294967280 }
  0x72   :  { %153 = sfence }
  0x73   :  { %v195_v0 = vld [vmem:[#allocation9 + $0x18] sm:$0xff]  ;;  %v930_v1 = vmov 0.0   ;;  %v194_v2 = vld [vmem:[#allocation9 + $0x10] sm:$0xff]  ;;  %s1036_s9 = sld [smem:[#allocation3]]  ;;  %vm931_vm0 = vmmov 0   ;;  %v193_v5 = vld [vmem:[#allocation9 + $0x8] sm:$0xff] }
  0x74   :  { %670 = vmatprep.subr.mxu1 %v930_v1  ;;  %659 = vmatprep.subr.mxu0 %v930_v1  ;;  %v191_v3 = vld [vmem:[#allocation7 + $0x18] sm:$0xff]  ;;  %v190_v4 = vld [vmem:[#allocation7 + $0x10] sm:$0xff]  ;;  %s1040_s10 = sld [smem:[#allocation3 + $0x1]]  ;;  %v189_v6 = vld [vmem:[#allocation7 + $0x8] sm:$0xff]  ;;  %vm205_vm1 = vcmask 261120   ;;  %vm157_vm2 = vcmask 253952  }
  0x75   :  { %671 = vmatpush3.msra.mxu1 %v195_v0  ;;  %678 = vmatprep.mubr.msk.f32.mxu1 %vm931_vm0, %v930_v1  ;;  %s1043_s8 = sld [smem:[#allocation3 + $0x2]]  ;;  %v192_v7 = vld [vmem:[#allocation9] sm:$0xff]  ;;  %v198_v8 = vld [vmem:[%s1125_s2] sm:$0xff]  ;;  %s932_s1 = smov 64   ;;  %v401_v38 = vld [vmem:[#allocation13 + $0x10] sm:$0xff] }
  0x76   :  { %672 = vmatprep.subr.mxu1 %v930_v1  ;;  %660 = vmatpush3.msra.mxu0 %v191_v3  ;;  %s1046_s23 = sld [smem:[#allocation3 + $0x3]]  ;;  %v188_v9 = vld [vmem:[#allocation7] sm:$0xff]  ;;  %s933_s4 = smov 32   ;;  %v627_v26 = vld [vmem:[%s1128_s5] ss:$0 sm:$0xff]  ;;  %v400_v40 = vld [vmem:[#allocation13 + $0x8] sm:$0xff] }
  0x77   :  { %673 = vmatpush3.msra.mxu1 %v194_v2  ;;  %661 = vmatprep.subr.mxu0 %v930_v1  ;;  %s1049_s24 = sld [smem:[#allocation3 + $0x4]]  ;;  %v631_v10 = vld [vmem:[#allocation10] ss:$0 sm:$0xff]  ;;  %v397_v41 = vld [vmem:[#allocation12 + $0x10] sm:$0xff]  ;;  %v637_v42 = vld [vmem:[#allocation16] ss:$0 sm:$0xff] }
  0x78   :  { %674 = vmatprep.subr.mxu1 %v930_v1  ;;  %662 = vmatpush3.msra.mxu0 %v190_v4  ;;  %s1055_s27 = sld [smem:[#allocation3 + $0x5]]  ;;  %v402_v37 = vld [vmem:[#allocation13 + $0x18] sm:$0xff]  ;;  %v399_v43 = vld [vmem:[#allocation13] sm:$0xff]  ;;  %v396_v44 = vld [vmem:[#allocation12 + $0x8] sm:$0xff]  ;;  %s934_s19 = smov 96  }
  0x79   :  { %675 = vmatpush3.msra.mxu1 %v193_v5  ;;  %663 = vmatprep.subr.mxu0 %v930_v1  ;;  %s1058_s28 = sld [smem:[#allocation3 + $0x6]]  ;;  %s155_s29 = scalar_lea.vmem [#allocation6], %s1036_s9  ;;  %v398_v39 = vld [vmem:[#allocation12 + $0x18] sm:$0xff]  ;;  %v632_v45 = vld [vmem:[%s1125_s2 + $0x8] sm:$0xff]  ;;  %v395_v46 = vld [vmem:[#allocation12] sm:$0xff] }
  0x7a   :  { %676 = vmatprep.subr.mxu1 %v930_v1  ;;  %664 = vmatpush3.msra.mxu0 %v189_v6  ;;  %v156_v11 = vld [vmem:[%s155_s29] sm:$0x1]  ;;  %s1062_s30 = sld [smem:[#allocation3 + $0x7]]  ;;  %s160_s12 = scalar_lea.vmem [#allocation6], %s1040_s10  ;;  %v633_v59 = vld [vmem:[#allocation15] ss:$0 sm:$0xff] }
  0x7b   :  { %677 = vmatpush3.msra.mxu1 %v192_v7  ;;  %665 = vmatprep.subr.mxu0 %v930_v1  ;;  %158 = vst.msk [vmem:[#allocation2] sm:$0x1] %vm157_vm2, %v156_v11  ;;  %v161_v12 = vld [vmem:[%s160_s12] sm:$0x1]  ;;  %s164_s13 = scalar_lea.vmem [#allocation6], %s1043_s8 }
  0x7c   :  { %679 = vmatmul.mubr.msk.f32.vlgmr.msra.gmra.mxu1 %vm205_vm1, %v198_v8  ;;  %666 = vmatpush3.msra.mxu0 %v188_v9  ;;  %162 = vst.msk [vmem:[#allocation2 + $0x1] sm:$0x1] %vm157_vm2, %v161_v12  ;;  %v165_v13 = vld [vmem:[%s164_s13] sm:$0x1]  ;;  %s168_s3 = scalar_lea.vmem [#allocation6], %s1046_s23 }
  0x7d   :  { %667 = vmatprep.mubr.msk.f32.mxu0 %vm931_vm0, %v930_v1  ;;  %364 = vrot.lane.b32.xlu0 %v631_v10, %s932_s1  ;;  %166 = vst.msk [vmem:[#allocation2 + $0x2] sm:$0x1] %vm157_vm2, %v165_v13  ;;  %v169_v14 = vld [vmem:[%s168_s3] sm:$0x1]  ;;  %s172_s14 = scalar_lea.vmem [#allocation6], %s1049_s24 }
  0x7e   :  { %692 = vmatprep.subr.mxu1 %v930_v1  ;;  %700 = vmatprep.mubr.msk.f32.mxu1 %vm931_vm0, %v930_v1  ;;  %170 = vst.msk [vmem:[#allocation2 + $0x3] sm:$0x1] %vm157_vm2, %v169_v14  ;;  %v173_v15 = vld [vmem:[%s172_s14] sm:$0x1]  ;;  %s176_s15 = scalar_lea.vmem [#allocation6], %s1055_s27 }
  0x7f   :  { %681 = vmatprep.subr.mxu0 %v930_v1  ;;  %174 = vst.msk [vmem:[#allocation2 + $0x4] sm:$0x1] %vm157_vm2, %v173_v15  ;;  %v177_v16 = vld [vmem:[%s176_s15] sm:$0x1]  ;;  %s180_s16 = scalar_lea.vmem [#allocation6], %s1058_s28  ;;  %693 = vmatpush3.msra.mxu1 %v402_v37 }
  0x80   :  { %178 = vst.msk [vmem:[#allocation2 + $0x5] sm:$0x1] %vm157_vm2, %v177_v16  ;;  %v181_v17 = vld [vmem:[%s180_s16] sm:$0x1]  ;;  %s184_s17 = scalar_lea.vmem [#allocation6], %s1062_s30  ;;  %694 = vmatprep.subr.mxu1 %v930_v1 }
  0x81   :  { %182 = vst.msk [vmem:[#allocation2 + $0x6] sm:$0x1] %vm157_vm2, %v181_v17  ;;  %v185_v18 = vld [vmem:[%s184_s17] sm:$0x1]  ;;  %695 = vmatpush3.msra.mxu1 %v401_v38 }
  0x82   :  { %186 = vst.msk [vmem:[#allocation2 + $0x7] sm:$0x1] %vm157_vm2, %v185_v18  ;;  %696 = vmatprep.subr.mxu1 %v930_v1 }
  0x83   :  { %697 = vmatpush3.msra.mxu1 %v400_v40 }
  0x84   :  { %698 = vmatprep.subr.mxu1 %v930_v1 }
  0x85   :  { %699 = vmatpush3.msra.mxu1 %v399_v43 }
  0x86   :  { %701 = vmatmul.mubr.msk.f32.vlgmr.msra.gmra.mxu1 %vm205_vm1, %v632_v45 }
  0x89   :  { %v187_v19 = vld [vmem:[#allocation2] sm:$0xff] }
  0x8a   :  { %668 = vmatmul.mubr.msk.f32.vlgmr.msra.gmra.mxu0 %vm205_vm1, %v187_v19 }
  0x8b   :  { %689 = vmatprep.mubr.msk.f32.mxu0 %vm931_vm0, %v930_v1  ;;  %682 = vmatpush3.msra.mxu0 %v398_v39 }
  0x8c   :  { %683 = vmatprep.subr.mxu0 %v930_v1 }
  0x8d   :  { %684 = vmatpush3.msra.mxu0 %v397_v41 }
  0x8e   :  { %685 = vmatprep.subr.mxu0 %v930_v1 }
  0x8f   :  { %686 = vmatpush3.msra.mxu0 %v396_v44 }
  0x90   :  { %687 = vmatprep.subr.mxu0 %v930_v1 }
  0x91   :  { %688 = vmatpush3.msra.mxu0 %v395_v46 }
  0xef   :  { %v365_v20 = vpop.permute.xlu0 %364 }
 0x13c   :  { %v348_v21 = vpop.f32.mrf.mxu1 }
 0x13d   :  { %v367_v22 = vadd.f32 %v365_v20, %v348_v21 }
 0x13e   :  { %v680_v23 = vpop.f32.mrf.mxu1 }
 0x13f   :  { %369 = vrot.lane.b32.xlu0 %v367_v22, %s932_s1 }
 0x143   :  { %385 = vrot.lane.b32.xlu0 %v198_v8, %s933_s4 }
 0x146   :  { %v554_v55 = vpop.f32.mrf.mxu1 }
 0x147   :  { %570 = vrot.lane.b32.xlu0 %v637_v42, %s932_s1 }
 0x148   :  { %v702_v57 = vpop.f32.mrf.mxu1 }
 0x14a   :  { %v275_v24 = vpop.f32.mrf.mxu0 }
 0x14b   :  { %v276_v27 = vadd.f32 %v627_v26, %v275_v24 }
 0x14c   :  { %v669_v25 = vpop.f32.mrf.mxu0 }
 0x14d   :  { %v352_v28 = vadd.f32 %v348_v21, %v276_v27 }
 0x14f   :  { %v630_v29 = vmul.f32 -1.442695, %v352_v28 }
 0x151   :  { %721 = vpow2.f32 %v630_v29 }
 0x15e   :  { %v722_v30 = vpop.eup %721 }
 0x15f   :  { %v356_v31 = vadd.f32 1.0, %v722_v30 }
 0x161   :  { %723 = vrcp.f32 %v356_v31 }
 0x16e   :  { %v724_v32 = vpop.eup %723 }
 0x16f   :  { %v379_v49 = vsub.f32 1.0, %v724_v32 }
 0x1b1   :  { %v370_v33 = vpop.permute.xlu0 %369 }
 0x1b2   :  { %v372_v34 = vmul.f32 %v724_v32, %v370_v33 }
 0x1b4   :  { %374 = vrot.lane.b32.xlu1 %v372_v34, %s932_s1 }
 0x1b5   :  { %v386_v48 = vpop.permute.xlu0 %385 }
 0x1b6   :  { %v388_v51 = vmul.f32 %v724_v32, %v386_v48 }
 0x1b9   :  { %v571_v54 = vpop.permute.xlu0 %570 }
 0x1ba   :  { %v573_v56 = vadd.f32 %v571_v54, %v554_v55 }
 0x226   :  { %v375_v35 = vpop.permute.xlu1 %374 }
 0x227   :  { %v377_v36 = vadd.f32 %v375_v35, %v276_v27 }
 0x229   :  { %725 = vtanh.f32 %v377_v36 }
 0x236   :  { %v726_v47 = vpop.eup %725 }
 0x237   :  { %381 = vrot.lane.b32.xlu1 %v726_v47, %s934_s19 }
 0x2a9   :  { %v382_v50 = vpop.permute.xlu1 %381 }
 0x2aa   :  { %v384_v52 = vmul.f32 %v382_v50, %v379_v49 }
 0x2ac   :  { %v389_v53 = vadd.f32 %v388_v51, %v384_v52 }
 0x2ae   :  { %391 = vrot.lane.b32.xlu1 %v389_v53, %s934_s19 }
 0x2b2   :  { %575 = vrot.lane.b32.xlu1 %v573_v56, %s932_s1 }
 0x320   :  { %v392_v58 = vpop.permute.xlu1 %391 }
 0x321   :  { %394 = vst.msk [vmem:[%s1134_s11] sm:$0xff] %vm205_vm1, %v392_v58  ;;  %690 = vmatmul.mubr.msk.f32.vlgmr.msra.gmra.mxu0 %vm205_vm1, %v392_v58 }
 0x324   :  { %v576_v3 = vpop.permute.xlu1 %575 }
 0x3e1   :  { %v481_v60 = vpop.f32.mrf.mxu0 }
 0x3e2   :  { %v482_v61 = vadd.f32 %v633_v59, %v481_v60 }
 0x3e3   :  { %v691_v62 = vpop.f32.mrf.mxu0 }
 0x3e4   :  { %v558_v63 = vadd.f32 %v554_v55, %v482_v61 }
 0x3e6   :  { %v636_v0 = vmul.f32 -1.442695, %v558_v63 }
 0x3e8   :  { %727 = vpow2.f32 %v636_v0 }
 0x3f5   :  { %v728_v1 = vpop.eup %727 }
 0x3f6   :  { %v562_v2 = vadd.f32 1.0, %v728_v1 }
 0x3f8   :  { %729 = vrcp.f32 %v562_v2 }
 0x405   :  { %v730_v4 = vpop.eup %729 }
 0x406   :  { %v578_v5 = vmul.f32 %v730_v4, %v576_v3  ;;  %v585_v10 = vsub.f32 1.0, %v730_v4 }
 0x408   :  { %580 = vrot.lane.b32.xlu0 %v578_v5, %s932_s1 }
 0x40c   :  { %591 = vrot.lane.b32.xlu0 %v632_v45, %s933_s4 }
 0x47a   :  { %v581_v6 = vpop.permute.xlu0 %580 }
 0x47b   :  { %v583_v7 = vadd.f32 %v581_v6, %v482_v61 }
 0x47d   :  { %731 = vtanh.f32 %v583_v7 }
 0x47e   :  { %v592_v9 = vpop.permute.xlu0 %591 }
 0x47f   :  { %v594_v12 = vmul.f32 %v730_v4, %v592_v9 }
 0x48a   :  { %v732_v8 = vpop.eup %731 }
 0x48b   :  { %587 = vrot.lane.b32.xlu1 %v732_v8, %s934_s19 }
 0x4fd   :  { %v588_v11 = vpop.permute.xlu1 %587 }
 0x4fe   :  { %v590_v13 = vmul.f32 %v588_v11, %v585_v10 }
 0x500   :  { %v595_v14 = vadd.f32 %v594_v12, %v590_v13 }
 0x502   :  { %597 = vrot.lane.b32.xlu1 %v595_v14, %s934_s19 }
 0x574   :  { %v598_v15 = vpop.permute.xlu1 %597 }
 0x575   :  { %638 = vst.msk [vmem:[%s1134_s11 + $0x8] sm:$0xff] %vm205_vm1, %v598_v15 }
 0x576   :  { %606 = vsyncpa [#allocation4], 1 }
 0x577   :  { %607 = vsyncpa [#allocation8], 1 }
 0x578   :  { %608 = vsyncpa [#allocation11], 1 }
 0x579   :  { %609 = vsyncpa [#allocation14], 1 }
 0x57a   :  { %610 = vsyncpa [#allocation17], 1 }
 0x57b   :  { %611 = vsyncpa [#allocation5], 1 }

</bundles_post_ra>
